<compile_context>
chip_gen: v6e
topology: v6e:2x2x1
jax: 0.10.0
libtpu: 0.0.40
codegen_flags: <defaults>
</compile_context>

<pallas_src>
import functools

import jax
import jax.numpy as jnp
from jax.experimental import pallas as pl
from jax.experimental.pallas import tpu as pltpu


def _combined_loss_kernel(w_ref,    # SMEM (num_heads,) f32 raw weights
                          o0_ref,   # VMEM (n0//128, 128) head-0 outputs (native dtype)
                          l0_ref,   # VMEM (n0//128, 128) head-0 labels
                          o1_ref,   # VMEM (n1//128, 128) head-1 outputs
                          l1_ref,   # VMEM (n1//128, 128) head-1 labels
                          out_ref,  # SMEM (1,) f32: total
                          *, num_heads, inv_n0, inv_n1):
    # Upcast in-kernel (free on the VPU at this size; keeps DMA bytes minimal).
    d0 = o0_ref[...].astype(jnp.float32) - l0_ref[...].astype(jnp.float32)
    d1 = o1_ref[...].astype(jnp.float32) - l1_ref[...].astype(jnp.float32)

    # Mean-then-weight (matches the reference's numerics exactly).
    mse0 = jnp.sum(d0 * d0) * inv_n0
    mse1 = jnp.sum(d1 * d1) * inv_n1
    total = w_ref[0] * mse0 + w_ref[1] * mse1

    # Heads >= 2 contribute only their scalar weight (PyTorch quirk).
    # Static Python loop over SMEM scalar reads -> scalar-ALU adds, effectively free.
    for i in range(2, num_heads):
        total = total + w_ref[i]

    out_ref[0] = total


def combined_weighted_losses(outputs, labels, weights):
    """outputs/labels: lists (>= 2 heads) of float arrays; weights: (num_heads,) f32.

    Heads 0 and 1 use mean-reduced MSE.  Heads >= 2 contribute only their scalar
    weight (matching the PyTorch module exactly), so their tensors are never
    transferred to the kernel.
    """
    num_heads = len(outputs)
    assert len(labels) == num_heads == weights.shape[0]
    assert num_heads >= 2

    n0 = outputs[0].size
    n1 = outputs[1].size
    assert n0 % 128 == 0 and n1 % 128 == 0, "head element counts must be multiples of 128"

    # Metadata-only reshapes to lane-dense (-1, 128) slabs; NO concatenate, NO astype.
    o0 = outputs[0].reshape(-1, 128)
    l0 = labels[0].reshape(-1, 128)
    o1 = outputs[1].reshape(-1, 128)
    l1 = labels[1].reshape(-1, 128)

    w = weights.astype(jnp.float32)

    kernel = functools.partial(
        _combined_loss_kernel,
        num_heads=num_heads,
        inv_n0=1.0 / n0,
        inv_n1=1.0 / n1,
    )

    bytes_accessed = (o0.size * o0.dtype.itemsize + l0.size * l0.dtype.itemsize
                      + o1.size * o1.dtype.itemsize + l1.size * l1.dtype.itemsize
                      + w.size * 4 + 4)

    out = pl.pallas_call(
        kernel,
        out_shape=jax.ShapeDtypeStruct((1,), jnp.float32),
        in_specs=[
            pl.BlockSpec(memory_space=pltpu.MemorySpace.SMEM),   # weights
            pl.BlockSpec(memory_space=pltpu.MemorySpace.VMEM),   # head-0 outputs
            pl.BlockSpec(memory_space=pltpu.MemorySpace.VMEM),   # head-0 labels
            pl.BlockSpec(memory_space=pltpu.MemorySpace.VMEM),   # head-1 outputs
            pl.BlockSpec(memory_space=pltpu.MemorySpace.VMEM),   # head-1 labels
        ],
        out_specs=pl.BlockSpec(memory_space=pltpu.MemorySpace.SMEM),
        cost_estimate=pl.CostEstimate(
            flops=3 * (n0 + n1),
            transcendentals=0,
            bytes_accessed=bytes_accessed,
        ),
    )(w, o0, l0, o1, l1)
    return out[0]


def _reference(outputs, labels, weights):
    """Pure-JAX replica of the PyTorch forward (including the i>=2 behavior)."""
    mse0 = jnp.mean((outputs[0].astype(jnp.float32) - labels[0].astype(jnp.float32)) ** 2)
    mse1 = jnp.mean((outputs[1].astype(jnp.float32) - labels[1].astype(jnp.float32)) ** 2)
    total = mse0 * weights[0] + weights[1] * mse1
    for i in range(2, len(outputs)):
        total = total + weights[i]
    return total


if __name__ == "__main__":
    key = jax.random.PRNGKey(0)
    ks = jax.random.split(key, 6)
    # Three heads, each NCHW = (2, 4, 16, 16)
    shape = (2, 4, 16, 16)
    outputs = [jax.random.normal(ks[i], shape, dtype=jnp.float32) for i in range(3)]
    labels = [jax.random.normal(ks[3 + i], shape, dtype=jnp.float32) for i in range(3)]
    weights = jnp.array([0.5, 0.3, 0.2], dtype=jnp.float32)

    total = combined_weighted_losses(outputs, labels, weights)
    total = jax.block_until_ready(total)

    ref = _reference(outputs, labels, weights)
    assert jnp.allclose(total, ref, rtol=1e-5, atol=1e-5), (total, ref)
    print("KERNEL_OK")
</pallas_src>

<mosaic_0001>
module attributes {stable_mosaic.version = 11 : i64} {
  func.func @_combined_loss_kernel(%arg0: memref<3xf32, #tpu.memory_space<smem>>, %arg1: memref<16x128xf32, #tpu.memory_space<vmem>>, %arg2: memref<16x128xf32, #tpu.memory_space<vmem>>, %arg3: memref<16x128xf32, #tpu.memory_space<vmem>>, %arg4: memref<16x128xf32, #tpu.memory_space<vmem>>, %arg5: memref<1xf32, #tpu.memory_space<smem>>) attributes {dimension_semantics = [], scalar_prefetch = 0 : i64, scratch_operands = 0 : i64, tpu.core_type = #tpu.core_type<tc>} {
    %c0 = arith.constant 0 : index
    %c0_0 = arith.constant 0 : index
    %0 = vector.load %arg1[%c0, %c0_0] : memref<16x128xf32, #tpu.memory_space<vmem>>, vector<16x128xf32>
    %c0_1 = arith.constant 0 : index
    %c0_2 = arith.constant 0 : index
    %1 = vector.load %arg2[%c0_1, %c0_2] : memref<16x128xf32, #tpu.memory_space<vmem>>, vector<16x128xf32>
    %2 = arith.subf %0, %1 : vector<16x128xf32>
    %c0_3 = arith.constant 0 : index
    %c0_4 = arith.constant 0 : index
    %3 = vector.load %arg3[%c0_3, %c0_4] : memref<16x128xf32, #tpu.memory_space<vmem>>, vector<16x128xf32>
    %c0_5 = arith.constant 0 : index
    %c0_6 = arith.constant 0 : index
    %4 = vector.load %arg4[%c0_5, %c0_6] : memref<16x128xf32, #tpu.memory_space<vmem>>, vector<16x128xf32>
    %5 = arith.subf %3, %4 : vector<16x128xf32>
    %6 = arith.mulf %2, %2 : vector<16x128xf32>
    %7 = vector.shape_cast %6 : vector<16x128xf32> to vector<1x16x128xf32>
    %cst = arith.constant dense<0.000000e+00> : vector<1xf32>
    %8 = vector.multi_reduction <add>, %7, %cst [1, 2] : vector<1x16x128xf32> to vector<1xf32>
    %9 = vector.shape_cast %8 : vector<1xf32> to vector<1x1x1xf32>
    %10 = vector.extract %9[0, 0, 0] : f32 from vector<1x1x1xf32>
    %cst_7 = arith.constant 4.8828125E-4 : f32
    %11 = arith.mulf %10, %cst_7 : f32
    %12 = arith.mulf %5, %5 : vector<16x128xf32>
    %13 = vector.shape_cast %12 : vector<16x128xf32> to vector<1x16x128xf32>
    %cst_8 = arith.constant dense<0.000000e+00> : vector<1xf32>
    %14 = vector.multi_reduction <add>, %13, %cst_8 [1, 2] : vector<1x16x128xf32> to vector<1xf32>
    %15 = vector.shape_cast %14 : vector<1xf32> to vector<1x1x1xf32>
    %16 = vector.extract %15[0, 0, 0] : f32 from vector<1x1x1xf32>
    %cst_9 = arith.constant 4.8828125E-4 : f32
    %17 = arith.mulf %16, %cst_9 : f32
    %c0_10 = arith.constant 0 : index
    %18 = memref.load %arg0[%c0_10] : memref<3xf32, #tpu.memory_space<smem>>
    %19 = arith.mulf %18, %11 : f32
    %c1 = arith.constant 1 : index
    %20 = memref.load %arg0[%c1] : memref<3xf32, #tpu.memory_space<smem>>
    %21 = arith.mulf %20, %17 : f32
    %22 = arith.addf %19, %21 : f32
    %c2 = arith.constant 2 : index
    %23 = memref.load %arg0[%c2] : memref<3xf32, #tpu.memory_space<smem>>
    %24 = arith.addf %22, %23 : f32
    %c0_11 = arith.constant 0 : index
    %25 = memref.load %arg5[%c0_11] : memref<1xf32, #tpu.memory_space<smem>>
    memref.store %24, %arg5[%c0_11] : memref<1xf32, #tpu.memory_space<smem>>
    return
  }
}

</mosaic_0001>

<bundles_post_ra>
// kernel: tpu_custom_call.1
= control target key start
LH: loop header
LB: loop body
LE: loop exit
PB: predicated region body
PF: predicated region fallthrough
CT: control target
= control target key end

     0   :  { %10 = vsyncpa [#allocation4], 0  ;;  %s339_s0 = inlined_call_operand.hbm [shape: f32[3], index: 0, kind: input, shape index: {}]   ;;  %s340_s1 = inlined_call_operand.hbm [shape: f32[16,128], index: 1, kind: input, shape index: {}]   ;;  %s341_s2 = inlined_call_operand.hbm [shape: f32[16,128], index: 2, kind: input, shape index: {}]   ;;  %s342_s3 = inlined_call_operand.hbm [shape: f32[16,128], index: 3, kind: input, shape index: {}]   ;;  %s343_s4 = inlined_call_operand.hbm [shape: f32[16,128], index: 4, kind: input, shape index: {}]   ;;  %s344_s5 = inlined_call_operand.hbm [shape: f32[1], index: 5, kind: output, shape index: {}]  }
   0x1   :  { %11 = vsyncpa [#allocation3], 0 }
   0x2   :  { %12 = vsyncpa [#allocation8], 0 }
   0x3   :  { %13 = vsyncpa [#allocation11], 0 }
   0x4   :  { %14 = vsyncpa [#allocation5], 0  ;;  %s271_s18 = smov [#allocation7]   ;;  %s272_s20 = smov [#allocation6]  }
   0x5   :  { %s40_s19 = sshll.u32 %s271_s18, 4  ;;  %s28_s21 = sshll.u32 %s272_s20, 4  ;;  %s41_s19 = int_to_ptr.vmem [resolvable:$true] %s40_s19  ;;  %s29_s21 = int_to_ptr.vmem [resolvable:$true] %s28_s21 }
   0x6   :  { %s173_s22 = scalar_lea.vmem %s41_s19, 256  ;;  %p178_p1 = scmp.lt.s32.totalorder %s41_s19, %s41_s19 }
   0x7   :  { %p174_p0 = scmp.ne.s32.totalorder %s41_s19, %s173_s22  ;;  %p179_p2 = scmp.lt.s32.totalorder %s173_s22, %s173_s22 }
   0x9   :  { %p180_p3 = por %p179_p2, %p178_p1 }
   0xb   :  { %p181_p4 = pnand %p180_p3, %p174_p0 }
   0xd   :  { %184 = shalt.err (!%p181_p4)
}
   0xe   :  { %s273_s23 = smov 128   ;;  %s274_s24 = smov 8  }
   0xf   :  { %46 = dma.hbm_to_vmem [thread:$0]  %s341_s2, 256, %s41_s19, [#allocation8], %s273_s23, %s273_s23, %s274_s24  }
  0x10   :  { %s275_s27 = smov [#allocation2]   ;;  %s201_s30 = scalar_lea.vmem %s29_s21, 256 }
  0x11   :  { %22 = dma.hbm_to_smem %s339_s0, 16, %s275_s27, [#allocation4]  }
  0x12   :  { %p202_p5 = scmp.ne.s32.totalorder %s29_s21, %s201_s30  ;;  %p206_p6 = scmp.lt.s32.totalorder %s29_s21, %s29_s21 }
  0x13   :  { %p207_p7 = scmp.lt.s32.totalorder %s201_s30, %s201_s30 }
  0x15   :  { %p208_p8 = por %p207_p7, %p206_p6 }
  0x17   :  { %p209_p9 = pnand %p208_p8, %p202_p5 }
  0x19   :  { %212 = shalt.err (!%p209_p9)
}
  0x1a   :  { %34 = dma.hbm_to_vmem [thread:$0]  %s340_s1, 256, %s29_s21, [#allocation3], %s273_s23, %s273_s23, %s274_s24  }
  0x1b   :  { %s276_s2 = smov [#allocation9]   ;;  %s277_s9 = smov [#allocation10]  }
  0x1c   :  { %s52_s8 = sshll.u32 %s276_s2, 4  ;;  %s64_s0 = sshll.u32 %s277_s9, 4  ;;  %s53_s8 = int_to_ptr.vmem [resolvable:$true] %s52_s8  ;;  %s65_s0 = int_to_ptr.vmem [resolvable:$true] %s64_s0 }
  0x1d   :  { %s221_s10 = scalar_lea.vmem %s53_s8, 256  ;;  %p226_p11 = scmp.lt.s32.totalorder %s53_s8, %s53_s8 }
  0x1e   :  { %p222_p10 = scmp.ne.s32.totalorder %s53_s8, %s221_s10  ;;  %p227_p12 = scmp.lt.s32.totalorder %s221_s10, %s221_s10 }
  0x20   :  { %p228_p13 = por %p227_p12, %p226_p11 }
  0x22   :  { %p229_p0 = pnand %p228_p13, %p222_p10 }
  0x24   :  { %232 = shalt.err (!%p229_p0)
}
  0x25   :  { %58 = dma.hbm_to_vmem [thread:$0]  %s342_s3, 256, %s53_s8, [#allocation8], %s273_s23, %s273_s23, %s274_s24  }
  0x26   :  { %s241_s1 = scalar_lea.vmem %s65_s0, 256  ;;  %p246_p2 = scmp.lt.s32.totalorder %s65_s0, %s65_s0 }
  0x27   :  { %p242_p1 = scmp.ne.s32.totalorder %s65_s0, %s241_s1  ;;  %p247_p3 = scmp.lt.s32.totalorder %s241_s1, %s241_s1 }
  0x29   :  { %p248_p4 = por %p247_p3, %p246_p2 }
  0x2b   :  { %p249_p5 = pnand %p248_p4, %p242_p1 }
  0x2d   :  { %252 = shalt.err (!%p249_p5)
}
  0x2e   :  { %70 = dma.hbm_to_vmem [thread:$0]  %s343_s4, 256, %s65_s0, [#allocation11], %s273_s23, %s273_s23, %s274_s24  }
  0x2f   :  { %261 = dma.done.wait [#allocation4], 16  }
  0x30   :  { %262 = vsyncadd [#allocation4], 4294967280 }
  0x31   :  { %263 = dma.done.wait [#allocation3], 256  }
  0x32   :  { %264 = vsyncadd [#allocation3], 4294967040 }
  0x33   :  { %265 = dma.done.wait [#allocation8], 512  }
  0x34   :  { %266 = vsyncadd [#allocation8], 4294966784 }
  0x35   :  { %267 = dma.done.wait [#allocation11], 256  }
  0x36   :  { %268 = vsyncadd [#allocation11], 4294967040 }
  0x37   :  { %86 = sfence }
  0x38   :  { %v87_v0 = vld [vmem:[#allocation6] sm:$0xff]  ;;  %v88_v1 = vld [vmem:[#allocation6 + $0x8] sm:$0xff]  ;;  %v89_v2 = vld [vmem:[#allocation7] sm:$0xff]  ;;  %s125_s3 = sld [smem:[#allocation2]]  ;;  %s278_s24 = smov [#allocation12]  }
  0x39   :  { %v90_v3 = vld [vmem:[#allocation7 + $0x8] sm:$0xff]  ;;  %v91_v4 = vsub.f32 %v87_v0, %v89_v2  ;;  %v93_v5 = vld [vmem:[#allocation9] sm:$0xff]  ;;  %v94_v6 = vld [vmem:[#allocation9 + $0x8] sm:$0xff]  ;;  %s151_s4 = sld [smem:[#allocation2 + $0x1]] }
  0x3a   :  { %v92_v7 = vsub.f32 %v88_v1, %v90_v3  ;;  %v95_v8 = vld [vmem:[#allocation10] sm:$0xff]  ;;  %v96_v9 = vld [vmem:[#allocation10 + $0x8] sm:$0xff]  ;;  %s152_s17 = sld [smem:[#allocation2 + $0x2]] }
  0x3b   :  { %v99_v10 = vmul.f32 %v91_v4, %v91_v4  ;;  %v97_v11 = vsub.f32 %v93_v5, %v95_v8  ;;  %v98_v12 = vsub.f32 %v94_v6, %v96_v9 }
  0x3c   :  { %v100_v13 = vmul.f32 %v92_v7, %v92_v7 }
  0x3d   :  { %v112_v14 = vmul.f32 %v97_v11, %v97_v11  ;;  %v113_v15 = vmul.f32 %v98_v12, %v98_v12 }
  0x3e   :  { %v101_v16 = vadd.f32 %v100_v13, %v99_v10 }
  0x3f   :  { %v114_v17 = vadd.f32 %v113_v15, %v112_v14 }
  0x40   :  { %102 = vadd.xlane.f32.xlu0 %v101_v16 }
  0x44   :  { %115 = vadd.xlane.f32.xlu0 %v114_v17 }
  0xc9   :  { %v103_v18 = vpop.xlane.xlu0 %102 }
  0xca   :  { %v104_v19 = vrot.slane %v103_v18, 4 }
  0xcc   :  { %v105_v20 = vadd.f32 %v104_v19, %v103_v18 }
  0xcd   :  { %v116_v21 = vpop.xlane.xlu0 %115 }
  0xce   :  { %v106_v22 = vrot.slane %v105_v20, 2  ;;  %v117_v23 = vrot.slane %v116_v21, 4 }
  0xd0   :  { %v118_v24 = vadd.f32 %v117_v23, %v116_v21  ;;  %v107_v25 = vadd.f32 %v106_v22, %v105_v20 }
  0xd2   :  { %v119_v26 = vrot.slane %v118_v24, 2  ;;  %v108_v27 = vrot.slane %v107_v25, 1 }
  0xd4   :  { %v120_v28 = vadd.f32 %v119_v26, %v118_v24  ;;  %v109_v29 = vadd.f32 %v108_v27, %v107_v25 }
  0xd6   :  { %153 = vpush %v109_v29  ;;  %v121_v30 = vrot.slane %v120_v28, 1 }
  0xd8   :  { %v122_v31 = vadd.f32 %v121_v30, %v120_v28 }
  0xda   :  { %155 = vpush %v122_v31 }
 0x107   :  { %s154_s15 = spop %153 }
 0x108   :  { %s111_s16 = smul.f32 0.00048828125, %s154_s15 }
 0x10a   :  { %s126_s20 = smul.f32 %s125_s3, %s111_s16 }
 0x10b   :  { %s156_s18 = spop %155 }
 0x10c   :  { %s124_s19 = smul.f32 0.00048828125, %s156_s18 }
 0x10e   :  { %s128_s21 = smul.f32 %s151_s4, %s124_s19 }
 0x110   :  { %s129_s22 = sadd.f32 %s128_s21, %s126_s20 }
 0x112   :  { %s131_s23 = sadd.f32 %s152_s17, %s129_s22 }
 0x114   :  { %133 = sst [smem:[#allocation12]] %s131_s23 }
 0x115   :  { %141 = dma.smem_to_hbm %s278_s24, 16, %s344_s5, [#allocation5]  }
 0x116   :  { %269 = dma.done.wait [#allocation5], 16  }
 0x117   :  { %270 = vsyncadd [#allocation5], 4294967280 }
 0x118   :  { %145 = sfence }
 0x119   :  { %146 = vsyncpa [#allocation3], 1 }
 0x11a   :  { %147 = vsyncpa [#allocation8], 1 }
 0x11b   :  { %148 = vsyncpa [#allocation11], 1 }
 0x11c   :  { %149 = vsyncpa [#allocation4], 1 }
 0x11d   :  { %150 = vsyncpa [#allocation5], 1 }

</bundles_post_ra>
